<compile_context>
chip_gen: v7x
topology: tpu7x:2x2x1
jax: 0.10.0
libtpu: 0.0.40
codegen_flags: <defaults>
</compile_context>

<pallas_src>
import jax
import jax.numpy as jnp
from jax.experimental import pallas as pl
from jax.experimental.pallas import tpu as pltpu


def _round_up(x, m):
    return ((x + m - 1) // m) * m


def _fused_kernel(x_ref, w1_ref, b1_ref, w2_ref, b2_ref, out_ref):
    """One row tile: h = relu(x @ W_fused + b_fused) ; out = h @ W2 + b2."""
    x = x_ref[...].astype(w1_ref.dtype)          # in-kernel cast (VPU), no wrapper HBM pass
    h = jnp.dot(x, w1_ref[...], preferred_element_type=jnp.float32)       # (TN, hp)
    h = jnp.maximum(h + b1_ref[...], 0.0)                                 # ReLU
    out = jnp.dot(h.astype(w2_ref.dtype), w2_ref[...],
                  preferred_element_type=jnp.float32)                     # (TN, Dout)
    out_ref[...] = (out + b2_ref[...]).astype(out_ref.dtype)


def haar_filter_weight_t(weight_t, theta):
    """idwt(theta * cA, details) for J=1 Haar, mode='zero', computed directly in
    the transposed (in, out) layout.

    For Haar with even dims, cA[i,j] = 0.5*sum of the (i,j) 2x2 block, and the
    LL synthesis spreads 0.5*coeff uniformly over that block, so
    idwt(theta*cA, cD) == weight + 0.5*(theta-1)*cA broadcast over each block.
    (This identity commutes with transposition; theta is transposed to match.)
    """
    Din, Hout = weight_t.shape
    assert Din % 2 == 0 and Hout % 2 == 0, "J=1 Haar DWT requires even weight dims"
    blocks = weight_t.reshape(Din // 2, 2, Hout // 2, 2)
    cA = 0.5 * blocks.sum(axis=(1, 3))                       # == cA(weight).T
    delta = 0.5 * (theta.T - 1.0) * cA
    return (blocks + delta[:, None, :, None]).reshape(Din, Hout)


def prepare_params(params, compute_dtype=jnp.bfloat16, lane=128):
    """One-time layout prep: transpose weights to (in, out) and zero-pad the
    hidden dim to a multiple of 128 lanes.  fc1 is kept in f32 because it is
    folded with the (theta-dependent) filtered weight per forward call; fc2 is
    pre-cast to the MXU compute dtype.  Only the Haar filter + fold of the
    frozen weight remains per-call work."""
    w = params["original_weight"]                 # (Hout, Din)
    Hout, Din = w.shape
    hid = params["fc1_w"].shape[0]
    Dout = params["fc2_w"].shape[0]
    hp = _round_up(hid, lane)

    bias = params.get("original_bias")
    if bias is None:
        bias = jnp.zeros((Hout,), jnp.float32)

    # fc1 transposed to (Hout, hp) with zero-padded hidden columns (kept f32
    # for the exact per-call fold); fc2 transposed to (hp, Dout) with
    # zero-padded hidden rows (matches the zero columns of the fused fc1).
    w1_t = jnp.pad(params["fc1_w"].astype(jnp.float32).T, ((0, 0), (0, hp - hid)))
    b1_p = jnp.pad(params["fc1_b"].astype(jnp.float32), (0, hp - hid))[None, :]
    w2_t = jnp.pad(params["fc2_w"].astype(jnp.float32).T, ((0, hp - hid), (0, 0)))

    return {
        "orig_w_t": w.T.astype(jnp.float32),      # (Din, Hout), f32 for exact wavelet math
        "theta": params["theta"].astype(jnp.float32),
        "b_row": bias.astype(jnp.float32)[None, :],                      # (1, Hout)
        "w1_t_f32": w1_t,                                                # (Hout, hp)
        "b1_p": b1_p,                                                    # (1, hp)
        "w2": w2_t.astype(compute_dtype),                                # (hp, Dout)
        "b2": params["fc2_b"].astype(jnp.float32)[None, :],              # (1, Dout)
        "dims": (Hout, Din, hid, Dout, hp),
        "compute_dtype": compute_dtype,
    }


def linear_wavelet_filter_forward(x, prepped, *, tile_rows=2048):
    """x: (B, S, Din) -> (B, S, Dout)."""
    B, S, Din = x.shape
    Hout, Din_p, hid, Dout, hp = prepped["dims"]
    assert Din == Din_p, "x feature dim must match original_weight in_features"
    cdt = prepped["compute_dtype"]

    # --- per-call (theta-dependent) prep: tiny f32 math in the wrapper -------
    wf_t = haar_filter_weight_t(prepped["orig_w_t"], prepped["theta"])    # (Din, Hout)
    # Fold the filtered linear into fc1 (no nonlinearity in between).
    w_fused = (wf_t @ prepped["w1_t_f32"]).astype(cdt)                    # (Din, hp)
    b_fused = prepped["b_row"] @ prepped["w1_t_f32"] + prepped["b1_p"]    # (1, hp), f32

    N = B * S
    # TN: multiple of 16 (valid f32/bf16 sublane tiles), capped at ~N/2 so the
    # "parallel" grid axis has >= 2 steps (keeps both v7x TensorCores busy).
    TN = min(tile_rows, max(16, _round_up(pl.cdiv(N, 2), 16)))
    Np = _round_up(N, TN)
    xf = x.reshape(N, Din)                        # original dtype; cast happens in-kernel
    if Np != N:
        xf = jnp.pad(xf, ((0, Np - N), (0, 0)))

    out_dtype = x.dtype
    x_isz = jnp.dtype(x.dtype).itemsize
    o_isz = jnp.dtype(out_dtype).itemsize
    c_isz = jnp.dtype(cdt).itemsize

    w_bytes = w_fused.size * c_isz + prepped["w2"].size * c_isz + (hp + Dout) * 4
    flops = 2 * Np * (Din * hp + hp * Dout)
    bytes_accessed = Np * Din * x_isz + Np * Dout * o_isz + w_bytes

    # VMEM footprint: double-buffered x/out tiles + (double-buffered) resident
    # weights + compiler-managed (TN, hp) f32 intermediates.  ~7 MiB even at
    # TN=4096 — well under v6e's 128 MiB and v7x's 64 MiB parts; the explicit
    # limit (floored at 16 MiB) keeps larger future tiles compiling on v5e,
    # whose scoped default is only 16 MiB.
    est_vmem = (2 * TN * Din * x_isz + 2 * TN * Dout * o_isz
                + 2 * w_bytes + 4 * TN * hp * 4)
    vmem_limit = int(min(max(2 * est_vmem, 16 << 20), 32 << 20))

    grid = (Np // TN,)
    out = pl.pallas_call(
        _fused_kernel,
        out_shape=jax.ShapeDtypeStruct((Np, Dout), out_dtype),
        grid=grid,
        in_specs=[
            pl.BlockSpec((TN, Din), lambda i: (i, 0)),   # x tile, streamed over N
            # Weights / biases stay resident (constant index_map -> (0, 0)).
            # TODO(synk): pipeline_mode=pl.Buffered(1) would drop their redundant
            # second buffer (~35 KB); skipped to stay on the most portable API.
            pl.BlockSpec((Din, hp), lambda i: (0, 0)),   # W_fused
            pl.BlockSpec((1, hp), lambda i: (0, 0)),     # b_fused
            pl.BlockSpec((hp, Dout), lambda i: (0, 0)),  # W2 (Dout-wide, no lane padding)
            pl.BlockSpec((1, Dout), lambda i: (0, 0)),   # b2
        ],
        out_specs=pl.BlockSpec((TN, Dout), lambda i: (i, 0)),
        compiler_params=pltpu.CompilerParams(
            dimension_semantics=("parallel",),
            vmem_limit_bytes=vmem_limit),
        cost_estimate=pl.CostEstimate(flops=flops, transcendentals=0,
                                      bytes_accessed=bytes_accessed),
    )(xf, w_fused, b_fused, prepped["w2"], prepped["b2"])

    return out[:N].reshape(B, S, Dout)


if __name__ == "__main__":
    key = jax.random.PRNGKey(0)
    k1, k2, k3, k4 = jax.random.split(key, 4)

    # Shapes implied by the module defaults: MLP input_dim=8 -> out_features=8,
    # hidden_dim=64, output_dim=8; in_features chosen 16 (even, for Haar J=1).
    B, S = 2, 8
    out_feat, in_feat = 8, 16
    hidden_dim, output_dim = 64, 8

    original_weight = jax.random.normal(k1, (out_feat, in_feat), jnp.float32)
    original_bias = jax.random.normal(k2, (out_feat,), jnp.float32)
    x = jax.random.normal(k3, (B, S, in_feat), jnp.float32)
    # Non-trivial theta so the wavelet-scaling path is actually exercised.
    theta = 1.0 + 0.25 * jax.random.normal(k4, (out_feat // 2, in_feat // 2), jnp.float32)

    params = {
        "original_weight": original_weight,
        "original_bias": original_bias,
        "theta": theta,
        # MLP(init='ones'): all weights and biases are ones
        "fc1_w": jnp.ones((hidden_dim, out_feat), jnp.float32),
        "fc1_b": jnp.ones((hidden_dim,), jnp.float32),
        "fc2_w": jnp.ones((output_dim, hidden_dim), jnp.float32),
        "fc2_b": jnp.ones((output_dim,), jnp.float32),
    }

    # ---- Pure-JAX reference: explicit J=1 Haar DWT -> theta*cA -> IDWT, f32 MLP.
    def explicit_haar_filter(w, th):
        H, W = w.shape
        b = w.reshape(H // 2, 2, W // 2, 2)
        w00, w01, w10, w11 = b[:, 0, :, 0], b[:, 0, :, 1], b[:, 1, :, 0], b[:, 1, :, 1]
        cA = 0.5 * (w00 + w01 + w10 + w11)
        cH = 0.5 * (w00 + w01 - w10 - w11)
        cV = 0.5 * (w00 - w01 + w10 - w11)
        cD = 0.5 * (w00 - w01 - w10 + w11)
        cA = cA * th
        r00 = 0.5 * (cA + cH + cV + cD)
        r01 = 0.5 * (cA + cH - cV - cD)
        r10 = 0.5 * (cA - cH + cV - cD)
        r11 = 0.5 * (cA - cH - cV + cD)
        rec = jnp.stack([jnp.stack([r00, r01], axis=-1),
                         jnp.stack([r10, r11], axis=-1)], axis=1)
        return rec.reshape(H, W)

    wf_ref = explicit_haar_filter(original_weight, theta)
    lin_ref = x.reshape(-1, in_feat) @ wf_ref.T + original_bias
    h_ref = jnp.maximum(lin_ref @ params["fc1_w"].T + params["fc1_b"], 0.0)
    ref = (h_ref @ params["fc2_w"].T + params["fc2_b"]).reshape(B, S, output_dim)

    # f32 compute path: tight check (validates the closed-form Haar identity
    # and the fc1 fold, which only reassociates f32 matmuls).
    prepped_f32 = prepare_params(params, compute_dtype=jnp.float32)
    out_f32 = jax.block_until_ready(linear_wavelet_filter_forward(x, prepped_f32))
    assert out_f32.shape == (B, S, output_dim)
    assert jnp.allclose(out_f32, ref, atol=1e-4, rtol=1e-4), "f32 mismatch vs reference"

    # bf16-MXU / f32-accumulate path (default, fast): loose check.
    prepped_bf16 = prepare_params(params, compute_dtype=jnp.bfloat16)
    out_bf16 = jax.block_until_ready(linear_wavelet_filter_forward(x, prepped_bf16))
    assert jnp.allclose(out_bf16, ref, atol=2.0, rtol=5e-2), "bf16 mismatch vs reference"

    print("KERNEL_OK")
</pallas_src>

<mosaic_0001>
module attributes {stable_mosaic.version = 11 : i64} {
  func.func @_fused_kernel(%arg0: i32, %arg1: memref<16x16xf32, #tpu.memory_space<vmem>>, %arg2: memref<16x128xf32, #tpu.memory_space<vmem>>, %arg3: memref<1x128xf32, #tpu.memory_space<vmem>>, %arg4: memref<128x8xf32, #tpu.memory_space<vmem>>, %arg5: memref<1x8xf32, #tpu.memory_space<vmem>>, %arg6: memref<16x8xf32, #tpu.memory_space<vmem>>) attributes {dimension_semantics = [#tpu.dimension_semantics<parallel>], iteration_bounds = array<i64: 1>, scalar_prefetch = 0 : i64, scratch_operands = 0 : i64, tpu.core_type = #tpu.core_type<tc>, window_params = [{transform_indices = @transform_0, window_bounds = array<i64: 16, 16>}, {pipeline_mode = #tpu.pipeline_mode<synchronous>, transform_indices = @transform_1, window_bounds = array<i64: 16, 128>}, {pipeline_mode = #tpu.pipeline_mode<synchronous>, transform_indices = @transform_2, window_bounds = array<i64: 1, 128>}, {pipeline_mode = #tpu.pipeline_mode<synchronous>, transform_indices = @transform_3, window_bounds = array<i64: 128, 8>}, {pipeline_mode = #tpu.pipeline_mode<synchronous>, transform_indices = @transform_4, window_bounds = array<i64: 1, 8>}, {transform_indices = @transform_5, window_bounds = array<i64: 16, 8>}]} {
    %c0 = arith.constant 0 : index
    %c0_0 = arith.constant 0 : index
    %0 = vector.load %arg1[%c0, %c0_0] : memref<16x16xf32, #tpu.memory_space<vmem>>, vector<16x16xf32>
    %c0_1 = arith.constant 0 : index
    %c0_2 = arith.constant 0 : index
    %1 = vector.load %arg2[%c0_1, %c0_2] : memref<16x128xf32, #tpu.memory_space<vmem>>, vector<16x128xf32>
    %cst = arith.constant dense<0.000000e+00> : vector<16x128xf32>
    %2 = tpu.matmul %0, %1, %cst {dimension_numbers = #tpu.dot_dimension_numbers<[1], [0], [0], [1], [0, 0, 1, 1], [], []>} : vector<16x16xf32>, vector<16x128xf32>, vector<16x128xf32> -> vector<16x128xf32>
    %c0_3 = arith.constant 0 : index
    %c0_4 = arith.constant 0 : index
    %3 = vector.load %arg3[%c0_3, %c0_4] : memref<1x128xf32, #tpu.memory_space<vmem>>, vector<1x128xf32>
    %4 = vector.broadcast %3 : vector<1x128xf32> to vector<16x128xf32>
    %5 = arith.addf %2, %4 : vector<16x128xf32>
    %cst_5 = arith.constant 0.000000e+00 : f32
    %6 = vector.broadcast %cst_5 : f32 to vector<16x128xf32>
    %7 = arith.maximumf %5, %6 : vector<16x128xf32>
    %c0_6 = arith.constant 0 : index
    %c0_7 = arith.constant 0 : index
    %8 = vector.load %arg4[%c0_6, %c0_7] : memref<128x8xf32, #tpu.memory_space<vmem>>, vector<128x8xf32>
    %cst_8 = arith.constant dense<0.000000e+00> : vector<16x8xf32>
    %9 = tpu.matmul %7, %8, %cst_8 {dimension_numbers = #tpu.dot_dimension_numbers<[1], [0], [0], [1], [0, 0, 1, 1], [], []>} : vector<16x128xf32>, vector<128x8xf32>, vector<16x8xf32> -> vector<16x8xf32>
    %c0_9 = arith.constant 0 : index
    %c0_10 = arith.constant 0 : index
    %10 = vector.load %arg5[%c0_9, %c0_10] : memref<1x8xf32, #tpu.memory_space<vmem>>, vector<1x8xf32>
    %11 = vector.broadcast %10 : vector<1x8xf32> to vector<16x8xf32>
    %12 = arith.addf %9, %11 : vector<16x8xf32>
    %c0_11 = arith.constant 0 : index
    %c0_12 = arith.constant 0 : index
    %13 = vector.load %arg6[%c0_11, %c0_12] : memref<16x8xf32, #tpu.memory_space<vmem>>, vector<16x8xf32>
    tpu.vector_store %arg6[%c0_11, %c0_12], %12 {strides = array<i32>} : memref<16x8xf32, #tpu.memory_space<vmem>>, vector<16x8xf32>,
    return
  }
  func.func @transform_0(%arg0: i32) -> (i32, i32) {
    %c0_i32 = arith.constant 0 : i32
    %c0_i32_0 = arith.constant 0 : i32
    return %arg0, %c0_i32 : i32, i32
  }
  func.func @transform_1(%arg0: i32) -> (i32, i32) {
    %c0_i32 = arith.constant 0 : i32
    %c0_i32_0 = arith.constant 0 : i32
    %c0_i32_1 = arith.constant 0 : i32
    return %c0_i32, %c0_i32_0 : i32, i32
  }
  func.func @transform_2(%arg0: i32) -> (i32, i32) {
    %c0_i32 = arith.constant 0 : i32
    %c0_i32_0 = arith.constant 0 : i32
    %c0_i32_1 = arith.constant 0 : i32
    return %c0_i32, %c0_i32_0 : i32, i32
  }
  func.func @transform_3(%arg0: i32) -> (i32, i32) {
    %c0_i32 = arith.constant 0 : i32
    %c0_i32_0 = arith.constant 0 : i32
    %c0_i32_1 = arith.constant 0 : i32
    return %c0_i32, %c0_i32_0 : i32, i32
  }
  func.func @transform_4(%arg0: i32) -> (i32, i32) {
    %c0_i32 = arith.constant 0 : i32
    %c0_i32_0 = arith.constant 0 : i32
    %c0_i32_1 = arith.constant 0 : i32
    return %c0_i32, %c0_i32_0 : i32, i32
  }
  func.func @transform_5(%arg0: i32) -> (i32, i32) {
    %c0_i32 = arith.constant 0 : i32
    %c0_i32_0 = arith.constant 0 : i32
    return %arg0, %c0_i32 : i32, i32
  }
}

</mosaic_0001>

<bundles_post_ra>
// kernel: tpu_custom_call.1
= control target key start
LH: loop header
LB: loop body
LE: loop exit
PB: predicated region body
PF: predicated region fallthrough
CT: control target
= control target key end

     0   :  { %vm31_vm0 = vcmask 130048   ;;  %vm213_vm1 = vcmask 64512   ;;  %s428_s1 = inlined_call_operand.vmem [shape: f32[16,128], index: 1, kind: input, shape index: {}]   ;;  %s429_s0 = inlined_call_operand.vmem [shape: f32[16,16], index: 0, kind: input, shape index: {}]   ;;  %s430_s3 = inlined_call_operand.vmem [shape: f32[128,8], index: 3, kind: input, shape index: {}]   ;;  %s431_s2 = inlined_call_operand.vmem [shape: f32[1,128], index: 2, kind: input, shape index: {}]   ;;  %s432_s4 = inlined_call_operand.vmem [shape: f32[1,8], index: 4, kind: input, shape index: {}]   ;;  %s433_s5 = inlined_call_operand.vmem [shape: f32[16,8], index: 5, kind: output, shape index: {}]  }
   0x1   :  { %v22_v0 = vld [vmem:[%s428_s1] sm:$0xff]  ;;  %v23_v1 = vld [vmem:[%s428_s1 + $0x8] sm:$0xff]  ;;  %v117_v7 = vld [vmem:[%s430_s3 + $0x10] sm:$0xff] }
   0x2   :  { %v20_v2 = vld [vmem:[%s429_s0] sm:$0xff]  ;;  %v288_v3 = vpack.c.bf16 %v23_v1, %v22_v0  ;;  %v116_v5 = vld [vmem:[%s430_s3 + $0x8] sm:$0xff]  ;;  %v118_v8 = vld [vmem:[%s430_s3 + $0x18] sm:$0xff] }
   0x3   :  { %250 = vmatprep.mubr.msk.f32.mxu0 %vm31_vm0, %v20_v2  ;;  %v115_v4 = vld [vmem:[%s430_s3] sm:$0xff]  ;;  %v296_v9 = vpack.c.bf16 %v118_v8, %v117_v7  ;;  %v120_v11 = vld [vmem:[%s430_s3 + $0x28] sm:$0xff]  ;;  %v121_v14 = vld [vmem:[%s430_s3 + $0x30] sm:$0xff] }
   0x4   :  { %v292_v6 = vpack.c.bf16 %v116_v5, %v115_v4  ;;  %289 = vmatprep.subr.bf16.mxu0 %v288_v3  ;;  %v119_v10 = vld [vmem:[%s430_s3 + $0x20] sm:$0xff]  ;;  %v21_v12 = vld [vmem:[%s429_s0 + $0x8] sm:$0xff]  ;;  %v122_v15 = vld [vmem:[%s430_s3 + $0x38] sm:$0xff] }
   0x5   :  { %291 = vmatpush3.bf16.msra.mxu0 %v288_v3  ;;  %v300_v13 = vpack.c.bf16 %v120_v11, %v119_v10  ;;  %v304_v16 = vpack.c.bf16 %v122_v15, %v121_v14  ;;  %v123_v17 = vld [vmem:[%s430_s3 + $0x40] sm:$0xff]  ;;  %v124_v18 = vld [vmem:[%s430_s3 + $0x48] sm:$0xff]  ;;  %v125_v20 = vld [vmem:[%s430_s3 + $0x50] sm:$0xff] }
   0x6   :  { %293 = vmatprep.subr.bf16.mxu1 %v292_v6  ;;  %v308_v19 = vpack.c.bf16 %v124_v18, %v123_v17  ;;  %v126_v21 = vld [vmem:[%s430_s3 + $0x58] sm:$0xff]  ;;  %v127_v23 = vld [vmem:[%s430_s3 + $0x60] sm:$0xff]  ;;  %v128_v24 = vld [vmem:[%s430_s3 + $0x68] sm:$0xff] }
   0x7   :  { %295 = vmatpush3.bf16.msra.mxu1 %v292_v6  ;;  %v312_v22 = vpack.c.bf16 %v126_v21, %v125_v20  ;;  %v316_v25 = vpack.c.bf16 %v128_v24, %v127_v23  ;;  %v129_v26 = vld [vmem:[%s430_s3 + $0x70] sm:$0xff]  ;;  %v130_v27 = vld [vmem:[%s430_s3 + $0x78] sm:$0xff]  ;;  %v220_v29 = vld [vmem:[%s431_s2] ss:$0 sm:$0xff] }
   0x8   :  { %297 = vmatprep.subr.bf16.mxu1 %v296_v9  ;;  %251 = vmatmul.mubr.msk.f32.vlgmr.msra.gmra.mrb[0].mxu0 %vm31_vm0, %v21_v12  ;;  %v320_v28 = vpack.c.bf16 %v130_v27, %v129_v26  ;;  %v223_v36 = vld [vmem:[%s432_s4] ss:$0 sm:$0xff] }
   0xb   :  { %299 = vmatpush3.bf16.msra.mxu1 %v296_v9 }
   0xc   :  { %301 = vmatprep.subr.bf16.mxu1 %v300_v13 }
   0xf   :  { %303 = vmatpush3.bf16.msra.mxu1 %v300_v13 }
  0x10   :  { %305 = vmatprep.subr.bf16.mxu1 %v304_v16 }
  0x13   :  { %307 = vmatpush3.bf16.msra.mxu1 %v304_v16 }
  0x14   :  { %309 = vmatprep.subr.bf16.mxu1 %v308_v19 }
  0x17   :  { %311 = vmatpush3.bf16.msra.mxu1 %v308_v19 }
  0x18   :  { %313 = vmatprep.subr.bf16.mxu1 %v312_v22 }
  0x1b   :  { %315 = vmatpush3.bf16.msra.mxu1 %v312_v22 }
  0x1c   :  { %317 = vmatprep.subr.bf16.mxu1 %v316_v25 }
  0x1f   :  { %319 = vmatpush3.bf16.msra.mxu1 %v316_v25 }
  0x20   :  { %321 = vmatprep.subr.bf16.mxu1 %v320_v28 }
  0x23   :  { %323 = vmatpush3.bf16.msra.mxu1 %v320_v28 }
  0xdb   :  { %v252_v30 = vpop.f32.mrb[0].mxu0 }
  0xdc   :  { %v110_v31 = vadd.f32 %v252_v30, %v220_v29  ;;  %v104_v32 = vpop.f32.mrb[1].mxu0 }
  0xdd   :  { %v105_v33 = vadd.f32 %v220_v29, %v104_v32 }
  0xde   :  { %v114_v35 = vmax.f32 %v110_v31, 0.0 }
  0xdf   :  { %v113_v34 = vmax.f32 %v105_v33, 0.0 }
  0xe1   :  { %285 = vmatprep.mubr.f32.mxu1 %v113_v34 }
  0xe2   :  { %286 = vmatmul.mubr.f32.vlgmr.msra.gmra.mrb[0].mxu1 %v114_v35 }
 0x1b5   :  { %v287_v37 = vpop.f32.mrb[0].mxu1 }
 0x1b6   :  { %v210_v38 = vadd.f32 %v287_v37, %v223_v36  ;;  %v204_v39 = vpop.f32.mrb[1].mxu1 }
 0x1b7   :  { %v205_v40 = vadd.f32 %v223_v36, %v204_v39 }
 0x1b8   :  { %215 = vst.msk [vmem:[%s433_s5 + $0x8] sm:$0xff] %vm213_vm1, %v210_v38 }
 0x1b9   :  { %214 = vst.msk [vmem:[%s433_s5] sm:$0xff] %vm213_vm1, %v205_v40 }

</bundles_post_ra>
